<compile_context>
chip_gen: v5e
topology: v5e:2x2
jax: 0.10.0
libtpu: 0.0.40
codegen_flags: <defaults>
</compile_context>

<pallas_src>
import jax
import jax.numpy as jnp
from jax.experimental import pallas as pl
from jax.experimental.pallas import tpu as pltpu

HYPER_PARAMS = {
    "num_dimensions": 1,
    "hidden_size": 150,
    "latent_size": 64,
    "sequence_length": 12,
    "kld_weight": 0.1,
}

LEAKY_SLOPE = 0.01      # nn.LeakyReLU() default negative_slope
_SMALL_BATCH = 512      # below this, one block is fastest (step overhead dominates)


def _round_up(x, m):
    return (x + m - 1) // m * m


def _leaky_relu(x):
    # Identical to leaky_relu for 0 < slope < 1; cheaper on the VPU (mul+max).
    return jnp.maximum(x, LEAKY_SLOPE * x)


def decoder_kernel(x_ref, w1_ref, b1_ref, w2_ref, b2_ref, out_ref):
    # x: [tb, latent]; w1: [latent, hidden_p]; b1: [1, hidden_p]
    # w2: [hidden_p, out_p]; b2: [1, out_p]; out: [tb, out_dim] (unpadded!)
    f32_inputs = w1_ref.dtype == jnp.float32
    precision = (jax.lax.Precision.HIGHEST if f32_inputs
                 else jax.lax.Precision.DEFAULT)

    x = x_ref[...].astype(w1_ref.dtype)
    h = jnp.dot(x, w1_ref[...], preferred_element_type=jnp.float32,
                precision=precision)
    h = _leaky_relu(h + b1_ref[...])            # f32 bias + activation

    y = jnp.dot(h.astype(w2_ref.dtype), w2_ref[...],
                preferred_element_type=jnp.float32, precision=precision)
    y = _leaky_relu(y + b2_ref[...])            # f32 bias + activation

    # Store only the real output columns; no padded slab ever reaches HBM.
    out_ref[...] = y[:, :out_ref.shape[1]].astype(out_ref.dtype)


def init_decoder_params(key, hyper_params):
    """PyTorch-like (unpadded) parameters; weights pre-transposed to [in, out]."""
    latent = hyper_params["latent_size"]
    hidden = hyper_params["hidden_size"]
    out_dim = hyper_params["num_dimensions"] * hyper_params["sequence_length"]

    k1, k2, k3, k4 = jax.random.split(key, 4)
    bound1 = 1.0 / jnp.sqrt(latent)
    bound2 = 1.0 / jnp.sqrt(hidden)
    w1 = jax.random.uniform(k1, (latent, hidden), jnp.float32, -bound1, bound1)
    b1 = jax.random.uniform(k2, (hidden,), jnp.float32, -bound1, bound1)
    w2 = jax.random.uniform(k3, (hidden, out_dim), jnp.float32, -bound2, bound2)
    b2 = jax.random.uniform(k4, (out_dim,), jnp.float32, -bound2, bound2)
    return (w1, b1, w2, b2)


def pack_decoder_params(params, *, use_bf16_matmuls=False):
    """Zero-pad feature dims to 128-multiples once, outside the hot path.

    use_bf16_matmuls=True stores the weights in bf16 for the fast MXU path
    (accuracy contract ~1e-2 instead of 1e-5); biases always stay f32.
    """
    w1, b1, w2, b2 = params
    latent, hidden = w1.shape
    out_dim = w2.shape[1]
    hidden_p = _round_up(hidden, 128)
    out_p = _round_up(out_dim, 128)
    wdt = jnp.bfloat16 if use_bf16_matmuls else jnp.float32

    w1p = jnp.zeros((latent, hidden_p), jnp.float32).at[:, :hidden].set(w1).astype(wdt)
    b1p = jnp.zeros((1, hidden_p), jnp.float32).at[0, :hidden].set(b1)
    w2p = (jnp.zeros((hidden_p, out_p), jnp.float32)
           .at[:hidden, :out_dim].set(w2).astype(wdt))
    b2p = jnp.zeros((1, out_p), jnp.float32).at[0, :out_dim].set(b2)
    return (w1p, b1p, w2p, b2p), out_dim


def _choose_batch_tile(B, batch_tile):
    batch_tile = max(8, _round_up(batch_tile, 8))
    if B <= batch_tile and B <= _SMALL_BATCH:
        return B  # single block; block dims == array dims, any B is legal
    # At least 2 grid steps so v7x's two TensorCores both get work under
    # dimension_semantics=("parallel",); tiles stay multiples of 8 rows.
    half = _round_up(pl.cdiv(B, 2), 8)
    return max(8, min(batch_tile, half))


def decoder_forward(x, packed_params, out_dim, sequence_length, *, batch_tile=2048):
    """x: [B, latent] (or anything reshapeable, matching PyTorch's x.view(B, -1))."""
    w1p, b1p, w2p, b2p = packed_params
    latent, hidden_p = w1p.shape
    out_p = w2p.shape[1]

    B = x.shape[0]
    x2d = x.reshape(B, -1).astype(jnp.float32)
    assert x2d.shape[1] == latent

    tb = _choose_batch_tile(B, batch_tile)
    # No wrapper-side jnp.pad: the final partial block (if any) is masked by
    # Pallas on both the x read and the output write.
    grid = (pl.cdiv(B, tb),)

    y = pl.pallas_call(
        decoder_kernel,
        out_shape=jax.ShapeDtypeStruct((B, out_dim), jnp.float32),
        grid_spec=pltpu.PrefetchScalarGridSpec(
            num_scalar_prefetch=0,
            grid=grid,
            in_specs=[
                # batch tile streamed through VMEM
                pl.BlockSpec((tb, latent), lambda i: (i, 0)),
                # weights / biases pinned resident in VMEM across the grid
                pl.BlockSpec((latent, hidden_p), lambda i: (0, 0)),
                pl.BlockSpec((1, hidden_p), lambda i: (0, 0)),
                pl.BlockSpec((hidden_p, out_p), lambda i: (0, 0)),
                pl.BlockSpec((1, out_p), lambda i: (0, 0)),
            ],
            out_specs=pl.BlockSpec((tb, out_dim), lambda i: (i, 0)),
        ),
        compiler_params=pltpu.CompilerParams(
            dimension_semantics=("parallel",),  # batch tiles independent (megacore)
        ),
    )(x2d, w1p, b1p, w2p, b2p)

    # x.view(B, seq_len, -1); reshape only, no slice of a padded slab.
    return y.reshape(B, sequence_length, -1)


def reference_forward(x, params, sequence_length):
    """Pure-JAX reference matching the PyTorch forward (unpadded params, f32)."""
    w1, b1, w2, b2 = params
    B = x.shape[0]
    hp = jax.lax.Precision.HIGHEST
    h = jnp.dot(x.reshape(B, -1), w1, precision=hp) + b1
    h = jnp.where(h >= 0, h, LEAKY_SLOPE * h)
    y = jnp.dot(h, w2, precision=hp) + b2
    y = jnp.where(y >= 0, y, LEAKY_SLOPE * y)
    return y.reshape(B, sequence_length, -1)


if __name__ == "__main__":
    key = jax.random.PRNGKey(0)
    k_params, k_x1, k_x2, k_x3 = jax.random.split(key, 4)

    params = init_decoder_params(k_params, HYPER_PARAMS)
    packed_f32, out_dim = pack_decoder_params(params)

    latent = HYPER_PARAMS["latent_size"]
    seq_len = HYPER_PARAMS["sequence_length"]
    num_dims = HYPER_PARAMS["num_dimensions"]

    # Case 1: small batch -> single grid step (block dims == array dims).
    B1 = 8
    x1 = jax.random.normal(k_x1, (B1, latent), dtype=jnp.float32)
    out1 = jax.block_until_ready(decoder_forward(x1, packed_f32, out_dim, seq_len))
    ref1 = reference_forward(x1, params, seq_len)
    assert out1.shape == (B1, seq_len, num_dims), out1.shape
    assert jnp.allclose(out1, ref1, atol=1e-5, rtol=1e-5), "mismatch (B=8, f32)"

    # Case 2: multi-step grid with a partial (masked) final block, no wrapper pad.
    B2 = 300
    x2 = jax.random.normal(k_x2, (B2, latent), dtype=jnp.float32)
    out2 = jax.block_until_ready(
        decoder_forward(x2, packed_f32, out_dim, seq_len, batch_tile=128))
    ref2 = reference_forward(x2, params, seq_len)
    assert out2.shape == (B2, seq_len, num_dims), out2.shape
    assert jnp.allclose(out2, ref2, atol=1e-5, rtol=1e-5), "mismatch (B=300, f32)"

    # Case 3: optional bf16 matmul-input fast path (looser accuracy contract).
    packed_bf16, _ = pack_decoder_params(params, use_bf16_matmuls=True)
    B3 = 256
    x3 = jax.random.normal(k_x3, (B3, latent), dtype=jnp.float32)
    out3 = jax.block_until_ready(decoder_forward(x3, packed_bf16, out_dim, seq_len))
    ref3 = reference_forward(x3, params, seq_len)
    assert out3.shape == (B3, seq_len, num_dims), out3.shape
    assert jnp.allclose(out3, ref3, atol=5e-2, rtol=5e-2), "mismatch (B=256, bf16)"

    print("KERNEL_OK")
</pallas_src>

<mosaic_0001>
module attributes {stable_mosaic.version = 11 : i64} {
  func.func @decoder_kernel(%arg0: i32, %arg1: memref<8x64xf32, #tpu.memory_space<vmem>>, %arg2: memref<64x256xf32, #tpu.memory_space<vmem>>, %arg3: memref<1x256xf32, #tpu.memory_space<vmem>>, %arg4: memref<256x128xf32, #tpu.memory_space<vmem>>, %arg5: memref<1x128xf32, #tpu.memory_space<vmem>>, %arg6: memref<8x12xf32, #tpu.memory_space<vmem>>) attributes {dimension_semantics = [#tpu.dimension_semantics<parallel>], iteration_bounds = array<i64: 1>, scalar_prefetch = 0 : i64, scratch_operands = 0 : i64, tpu.core_type = #tpu.core_type<tc>, window_params = [{transform_indices = @transform_0, window_bounds = array<i64: 8, 64>}, {pipeline_mode = #tpu.pipeline_mode<synchronous>, transform_indices = @transform_1, window_bounds = array<i64: 64, 256>}, {pipeline_mode = #tpu.pipeline_mode<synchronous>, transform_indices = @transform_2, window_bounds = array<i64: 1, 256>}, {pipeline_mode = #tpu.pipeline_mode<synchronous>, transform_indices = @transform_3, window_bounds = array<i64: 256, 128>}, {pipeline_mode = #tpu.pipeline_mode<synchronous>, transform_indices = @transform_4, window_bounds = array<i64: 1, 128>}, {transform_indices = @transform_5, window_bounds = array<i64: 8, 12>}]} {
    %c0 = arith.constant 0 : index
    %c0_0 = arith.constant 0 : index
    %0 = vector.load %arg1[%c0, %c0_0] : memref<8x64xf32, #tpu.memory_space<vmem>>, vector<8x64xf32>
    %c0_1 = arith.constant 0 : index
    %c0_2 = arith.constant 0 : index
    %1 = vector.load %arg2[%c0_1, %c0_2] : memref<64x256xf32, #tpu.memory_space<vmem>>, vector<64x256xf32>
    %cst = arith.constant dense<0.000000e+00> : vector<8x256xf32>
    %2 = tpu.matmul %0, %1, %cst {dimension_numbers = #tpu.dot_dimension_numbers<[1], [0], [0], [1], [0, 0, 1, 1], [], []>, precision = #tpu.contract_precision<fp32>} : vector<8x64xf32>, vector<64x256xf32>, vector<8x256xf32> -> vector<8x256xf32>
    %c0_3 = arith.constant 0 : index
    %c0_4 = arith.constant 0 : index
    %3 = vector.load %arg3[%c0_3, %c0_4] : memref<1x256xf32, #tpu.memory_space<vmem>>, vector<1x256xf32>
    %4 = vector.broadcast %3 : vector<1x256xf32> to vector<8x256xf32>
    %5 = arith.addf %2, %4 : vector<8x256xf32>
    %cst_5 = arith.constant 0.00999999977 : f32
    %6 = vector.broadcast %cst_5 : f32 to vector<8x256xf32>
    %7 = arith.mulf %6, %5 : vector<8x256xf32>
    %8 = arith.maximumf %5, %7 : vector<8x256xf32>
    %c0_6 = arith.constant 0 : index
    %c0_7 = arith.constant 0 : index
    %9 = vector.load %arg4[%c0_6, %c0_7] : memref<256x128xf32, #tpu.memory_space<vmem>>, vector<256x128xf32>
    %cst_8 = arith.constant dense<0.000000e+00> : vector<8x128xf32>
    %10 = tpu.matmul %8, %9, %cst_8 {dimension_numbers = #tpu.dot_dimension_numbers<[1], [0], [0], [1], [0, 0, 1, 1], [], []>, precision = #tpu.contract_precision<fp32>} : vector<8x256xf32>, vector<256x128xf32>, vector<8x128xf32> -> vector<8x128xf32>
    %c0_9 = arith.constant 0 : index
    %c0_10 = arith.constant 0 : index
    %11 = vector.load %arg5[%c0_9, %c0_10] : memref<1x128xf32, #tpu.memory_space<vmem>>, vector<1x128xf32>
    %12 = vector.broadcast %11 : vector<1x128xf32> to vector<8x128xf32>
    %13 = arith.addf %10, %12 : vector<8x128xf32>
    %cst_11 = arith.constant 0.00999999977 : f32
    %14 = vector.broadcast %cst_11 : f32 to vector<8x128xf32>
    %15 = arith.mulf %14, %13 : vector<8x128xf32>
    %16 = arith.maximumf %13, %15 : vector<8x128xf32>
    %17 = vector.extract_strided_slice %16 {offsets = [0, 0], sizes = [8, 12], strides = [1, 1]} : vector<8x128xf32> to vector<8x12xf32>
    %c0_12 = arith.constant 0 : index
    %c0_13 = arith.constant 0 : index
    %18 = vector.load %arg6[%c0_12, %c0_13] : memref<8x12xf32, #tpu.memory_space<vmem>>, vector<8x12xf32>
    tpu.vector_store %arg6[%c0_12, %c0_13], %17 {strides = array<i32>} : memref<8x12xf32, #tpu.memory_space<vmem>>, vector<8x12xf32>,
    return
  }
  func.func @transform_0(%arg0: i32) -> (i32, i32) {
    %c0_i32 = arith.constant 0 : i32
    %c0_i32_0 = arith.constant 0 : i32
    return %arg0, %c0_i32 : i32, i32
  }
  func.func @transform_1(%arg0: i32) -> (i32, i32) {
    %c0_i32 = arith.constant 0 : i32
    %c0_i32_0 = arith.constant 0 : i32
    %c0_i32_1 = arith.constant 0 : i32
    return %c0_i32, %c0_i32_0 : i32, i32
  }
  func.func @transform_2(%arg0: i32) -> (i32, i32) {
    %c0_i32 = arith.constant 0 : i32
    %c0_i32_0 = arith.constant 0 : i32
    %c0_i32_1 = arith.constant 0 : i32
    return %c0_i32, %c0_i32_0 : i32, i32
  }
  func.func @transform_3(%arg0: i32) -> (i32, i32) {
    %c0_i32 = arith.constant 0 : i32
    %c0_i32_0 = arith.constant 0 : i32
    %c0_i32_1 = arith.constant 0 : i32
    return %c0_i32, %c0_i32_0 : i32, i32
  }
  func.func @transform_4(%arg0: i32) -> (i32, i32) {
    %c0_i32 = arith.constant 0 : i32
    %c0_i32_0 = arith.constant 0 : i32
    %c0_i32_1 = arith.constant 0 : i32
    return %c0_i32, %c0_i32_0 : i32, i32
  }
  func.func @transform_5(%arg0: i32) -> (i32, i32) {
    %c0_i32 = arith.constant 0 : i32
    %c0_i32_0 = arith.constant 0 : i32
    return %arg0, %c0_i32 : i32, i32
  }
}

</mosaic_0001>

<bundles_post_ra>
// kernel: tpu_custom_call.1
= control target key start
LH: loop header
LB: loop body
LE: loop exit
PB: predicated region body
PF: predicated region fallthrough
CT: control target
= control target key end

     0   :  { %10 = vsyncpa [#allocation3], 0  ;;  %s2262_s0 = inlined_call_operand.hbm [shape: f32[8,64], index: 0, kind: input, shape index: {}]   ;;  %s2263_s1 = inlined_call_operand.hbm [shape: f32[64,256], index: 1, kind: input, shape index: {}]   ;;  %s2264_s2 = inlined_call_operand.hbm [shape: f32[1,256], index: 2, kind: input, shape index: {}]   ;;  %s2265_s3 = inlined_call_operand.hbm [shape: f32[256,128], index: 3, kind: input, shape index: {}]   ;;  %s2266_s4 = inlined_call_operand.vmem [shape: f32[1,128], index: 4, kind: input, shape index: {}]   ;;  %s2267_s5 = inlined_call_operand.hbm [shape: f32[8,12], index: 5, kind: output, shape index: {}]  }
   0x1   :  { %11 = vsyncpa [#allocation6], 0 }
   0x2   :  { %12 = vsyncpa [#allocation9], 0  ;;  %s29_s20 = sshll.u32 %s2263_s1, 4  ;;  %s30_s20 = int_to_ptr.hbm [resolvable:$true] %s29_s20 }
   0x3   :  { %13 = vsyncpa [#allocation4], 0  ;;  %s1464_s21 = smov [#allocation5]   ;;  %s19_s25 = sshll.u32 %s2262_s0, 4  ;;  %s20_s25 = int_to_ptr.hbm [resolvable:$true] %s19_s25 }
   0x4   :  { %s31_s22 = sshll.u32 %s1464_s21, 4  ;;  %s1465_s26 = smov 256   ;;  %s32_s22 = int_to_ptr.vmem [resolvable:$true] %s31_s22 }
   0x5   :  { %s1466_s27 = smov 16   ;;  %s1467_s28 = smov [#allocation2]  }
   0x6   :  { %37 = dma.hbm_to_vmem [thread:$0]  %s30_s20, 2048, %s32_s22, [#allocation6], %s1465_s26, %s1465_s26, %s1466_s27  }
   0x7   :  { %s21_s29 = sshll.u32 %s1467_s28, 4  ;;  %s43_s7 = sshll.u32 %s2264_s2, 4  ;;  %s22_s29 = int_to_ptr.vmem [resolvable:$true] %s21_s29  ;;  %s44_s7 = int_to_ptr.hbm [resolvable:$true] %s43_s7 }
   0x8   :  { %24 = dma.hbm_to_vmem [thread:$0]  %s20_s25, 128, %s22_s29, [#allocation3]  }
   0x9   :  { %s53_s9 = sshll.u32 %s2265_s3, 4  ;;  %s1468_s10 = smov [#allocation7]   ;;  %s54_s9 = int_to_ptr.hbm [resolvable:$true] %s53_s9 }
   0xa   :  { %s45_s11 = sshll.u32 %s1468_s10, 4  ;;  %s1469_s0 = smov [#allocation8]   ;;  %s46_s11 = int_to_ptr.vmem [resolvable:$true] %s45_s11 }
   0xb   :  { %48 = dma.hbm_to_vmem [thread:$0]  %s44_s7, 32, %s46_s11, [#allocation6]  }
   0xc   :  { %s55_s12 = sshll.u32 %s1469_s0, 4  ;;  %s1470_s13 = smov 128   ;;  %s56_s12 = int_to_ptr.vmem [resolvable:$true] %s55_s12 }
   0xd   :  { %s1471_s14 = smov 8  }
   0xe   :  { %61 = dma.hbm_to_vmem [thread:$0]  %s54_s9, 4096, %s56_s12, [#allocation9], %s1470_s13, %s1470_s13, %s1471_s14  }
   0xf   :  { %1456 = dma.done.wait [#allocation3], 128  }
  0x10   :  { %1457 = vsyncadd [#allocation3], 4294967168 }
  0x11   :  { %1458 = dma.done.wait [#allocation6], 2080  }
  0x12   :  { %1459 = vsyncadd [#allocation6], 4294965216 }
  0x13   :  { %1460 = dma.done.wait [#allocation9], 4096  }
  0x14   :  { %1461 = vsyncadd [#allocation9], 4294963200  ;;  %v95_v0 = vld [vmem:[#allocation5 + $0x70] sm:$0xff]  ;;  %v93_v1 = vld [vmem:[#allocation5 + $0x60] sm:$0xff]  ;;  %vm103_vm0 = vcmask 523264   ;;  %s1314_s18 = sshll.u32 %s2267_s5, 4  ;;  %s1315_s18 = int_to_ptr.hbm [resolvable:$true] %s1314_s18 }
  0x15   :  { %v91_v2 = vld [vmem:[#allocation5 + $0x50] sm:$0xff]  ;;  %v1515_v3 = vand.u32 4294901760, %v95_v0  ;;  %v1517_v4 = vand.u32 4294901760, %v93_v1  ;;  %v89_v6 = vld [vmem:[#allocation5 + $0x40] sm:$0xff]  ;;  %v96_v22 = vld [vmem:[#allocation5 + $0x78] sm:$0xff]  ;;  %vm1305_vm1 = vcmask 97280  }
  0x16   :  { %v1519_v5 = vand.u32 4294901760, %v91_v2  ;;  %v87_v7 = vld [vmem:[#allocation5 + $0x30] sm:$0xff]  ;;  %v85_v8 = vld [vmem:[#allocation5 + $0x20] sm:$0xff]  ;;  %v1521_v9 = vand.u32 4294901760, %v89_v6  ;;  %v94_v30 = vld [vmem:[#allocation5 + $0x68] sm:$0xff]  ;;  %v1574_v34 = vand.u32 4294901760, %v96_v22 }
  0x17   :  { %v1523_v10 = vand.u32 4294901760, %v87_v7  ;;  %v1525_v11 = vand.u32 4294901760, %v85_v8  ;;  %v83_v12 = vld [vmem:[#allocation5 + $0x10] sm:$0xff]  ;;  %v81_v13 = vld [vmem:[#allocation5] sm:$0xff]  ;;  %v1528_v14 = vsub.f32 %v95_v0, %v1515_v3  ;;  %116 = vmatpush.msra.mxu0 %v1515_v3  ;;  %v1532_v15 = vsub.f32 %v93_v1, %v1517_v4  ;;  %248 = vmatpush.msra.mxu3 %v1515_v3  ;;  %v92_v36 = vld [vmem:[#allocation5 + $0x58] sm:$0xff] }
  0x18   :  { %v1536_v16 = vsub.f32 %v91_v2, %v1519_v5  ;;  %v1538_v17 = vand.u32 4294901760, %v83_v12  ;;  %v1541_v18 = vsub.f32 %v89_v6, %v1521_v9  ;;  %v1549_v21 = vand.u32 4294901760, %v81_v13  ;;  %v90_v41 = vld [vmem:[#allocation5 + $0x48] sm:$0xff]  ;;  %v80_v42 = vld [vmem:[#allocation2] sm:$0xff] }
  0x19   :  { %v1544_v19 = vsub.f32 %v87_v7, %v1523_v10  ;;  %v1547_v20 = vsub.f32 %v85_v8, %v1525_v11  ;;  %211 = vmatpush.msra.mxu2 %v1528_v14  ;;  %118 = vmatpush.msra.mxu0 %v1517_v4  ;;  %v150_v23 = vand.u32 4294901760, %v1528_v14  ;;  %v156_v24 = vand.u32 4294901760, %v1532_v15  ;;  %v88_v43 = vld [vmem:[#allocation5 + $0x38] sm:$0xff]  ;;  %v86_v55 = vld [vmem:[#allocation5 + $0x28] sm:$0xff] }
  0x1a   :  { %v162_v25 = vand.u32 4294901760, %v1536_v16  ;;  %250 = vmatpush.msra.mxu3 %v1517_v4  ;;  %v168_v26 = vand.u32 4294901760, %v1541_v18  ;;  %v1560_v28 = vsub.f32 %v83_v12, %v1538_v17  ;;  %v1578_v35 = vsub.f32 %v81_v13, %v1549_v21  ;;  %v84_v0 = vld [vmem:[#allocation5 + $0x18] sm:$0xff] }
  0x1b   :  { %v174_v27 = vand.u32 4294901760, %v1544_v19  ;;  %v180_v29 = vand.u32 4294901760, %v1547_v20  ;;  %214 = vmatpush.msra.mxu2 %v1532_v15  ;;  %v151_v31 = vsub.f32 %v1528_v14, %v150_v23  ;;  %120 = vmatpush.msra.mxu0 %v1519_v5  ;;  %v157_v32 = vsub.f32 %v1532_v15, %v156_v24 }
  0x1c   :  { %v163_v33 = vsub.f32 %v1536_v16, %v162_v25  ;;  %252 = vmatpush.msra.mxu3 %v1519_v5  ;;  %v169_v39 = vsub.f32 %v1541_v18, %v168_v26  ;;  %v1585_v40 = vand.u32 4294901760, %v94_v30  ;;  %v186_v46 = vand.u32 4294901760, %v1560_v28 }
  0x1d   :  { %v152_v37 = vand.u32 4294901760, %v151_v31  ;;  %217 = vmatpush.msra.mxu2 %v1536_v16  ;;  %v158_v38 = vand.u32 4294901760, %v157_v32  ;;  %122 = vmatpush.msra.mxu0 %v1521_v9  ;;  %v175_v44 = vsub.f32 %v1544_v19, %v174_v27  ;;  %v181_v45 = vsub.f32 %v1547_v20, %v180_v29 }
  0x1e   :  { %254 = vmatpush.msra.mxu3 %v1521_v9  ;;  %v164_v47 = vand.u32 4294901760, %v163_v33  ;;  %v1597_v48 = vsub.f32 %v96_v22, %v1574_v34  ;;  %v1599_v49 = vand.u32 4294901760, %v92_v36  ;;  %v1602_v50 = vsub.f32 %v94_v30, %v1585_v40  ;;  %v82_v30 = vld [vmem:[#allocation5 + $0x8] sm:$0xff] }
  0x1f   :  { %153 = vmatpush.msra.mxu1 %v152_v37  ;;  %220 = vmatpush.msra.mxu2 %v1541_v18  ;;  %v192_v51 = vand.u32 4294901760, %v1578_v35  ;;  %v1607_v52 = vand.u32 4294901760, %v90_v41  ;;  %v105_v53 = vsel %vm103_vm0, %v80_v42, 0  ;;  %v1610_v54 = vand.u32 4294901760, %v88_v43 }
  0x20   :  { %124 = vmatpush.msra.mxu0 %v1523_v10  ;;  %256 = vmatpush.msra.mxu3 %v1523_v10  ;;  %v170_v56 = vand.u32 4294901760, %v169_v39  ;;  %v387_v57 = vand.u32 4294901760, %v1597_v48  ;;  %v393_v58 = vand.u32 4294901760, %v1602_v50  ;;  %v1616_v59 = vsub.f32 %v92_v36, %v1599_v49 }
  0x21   :  { %159 = vmatpush.msra.mxu1 %v158_v38  ;;  %223 = vmatpush.msra.mxu2 %v1544_v19  ;;  %v176_v60 = vand.u32 4294901760, %v175_v44  ;;  %v187_v61 = vsub.f32 %v1560_v28, %v186_v46  ;;  %v1623_v62 = vand.u32 4294901760, %v105_v53  ;;  %v1626_v63 = vsub.f32 %v90_v41, %v1607_v52 }
  0x22   :  { %126 = vmatpush.msra.mxu0 %v1525_v11  ;;  %258 = vmatpush.msra.mxu3 %v1525_v11  ;;  %v388_v1 = vsub.f32 %v1597_v48, %v387_v57  ;;  %v394_v2 = vsub.f32 %v1602_v50, %v393_v58  ;;  %v399_v6 = vand.u32 4294901760, %v1616_v59  ;;  %v1636_v7 = vand.u32 4294901760, %v86_v55 }
  0x23   :  { %165 = vmatpush.msra.mxu1 %v164_v47  ;;  %226 = vmatpush.msra.mxu2 %v1547_v20  ;;  %v182_v8 = vand.u32 4294901760, %v181_v45  ;;  %v193_v12 = vsub.f32 %v1578_v35, %v192_v51  ;;  %v1644_v13 = vsub.f32 %v105_v53, %v1623_v62  ;;  %v1647_v22 = vsub.f32 %v88_v43, %v1610_v54 }
  0x24   :  { %128 = vmatpush.msra.mxu0 %v1538_v17  ;;  %260 = vmatpush.msra.mxu3 %v1538_v17  ;;  %v389_v31 = vand.u32 4294901760, %v388_v1  ;;  %v400_v32 = vsub.f32 %v1616_v59, %v399_v6  ;;  %v405_v33 = vand.u32 4294901760, %v1626_v63  ;;  %v1654_v36 = vand.u32 4294901760, %v84_v0 }
  0x25   :  { %171 = vmatpush.msra.mxu1 %v170_v56  ;;  %229 = vmatpush.msra.mxu2 %v1560_v28  ;;  %v1659_v37 = vand.u32 4294901760, %v1644_v13  ;;  %v188_v38 = vand.u32 4294901760, %v187_v61  ;;  %v395_v39 = vand.u32 4294901760, %v394_v2  ;;  %v1663_v41 = vsub.f32 %v86_v55, %v1636_v7  ;;  %v592_v2 = vld [vmem:[#allocation8 + $0x38] sm:$0xff] }
  0x26   :  { %130 = vmatpush.msra.mxu0 %v1549_v21  ;;  %262 = vmatpush.msra.mxu3 %v1549_v21  ;;  %v1665_v42 = vand.u32 4294901760, %v82_v30  ;;  %v194_v43 = vand.u32 4294901760, %v193_v12  ;;  %v411_v44 = vand.u32 4294901760, %v1647_v22  ;;  %v401_v45 = vand.u32 4294901760, %v400_v32 }
  0x27   :  { %177 = vmatpush.msra.mxu1 %v176_v60  ;;  %232 = vmatpush.msra.mxu2 %v1578_v35  ;;  %v406_v47 = vsub.f32 %v1626_v63, %v405_v33  ;;  %v134_v53 = vsub.f32 %v1644_v13, %v1659_v37  ;;  %v1677_v55 = vsub.f32 %v84_v0, %v1654_v36  ;;  %v417_v14 = vand.u32 4294901760, %v1663_v41 }
  0x28   :  { %281 = vmatpush.msrb.mxu0 %v150_v23  ;;  %390 = vmatpush.msrb.mxu3 %v389_v31  ;;  %v1684_v23 = vsub.f32 %v82_v30, %v1665_v42  ;;  %v412_v56 = vsub.f32 %v1647_v22, %v411_v44  ;;  %v1822_v32 = vand.u32 4294901760, %v592_v2 }
  0x29   :  { %353 = vmatpush.msrb.mxu2 %v1574_v34  ;;  %183 = vmatpush.msra.mxu1 %v182_v8  ;;  %v407_v15 = vand.u32 4294901760, %v406_v47  ;;  %v423_v60 = vand.u32 4294901760, %v1677_v55  ;;  %v418_v16 = vsub.f32 %v1663_v41, %v417_v14 }
  0x2a   :  { %285 = vmatpush.msrb.mxu0 %v156_v24  ;;  %396 = vmatpush.msrb.mxu3 %v395_v39  ;;  %v135_v24 = vand.u32 4294901760, %v134_v53  ;;  %v413_v61 = vand.u32 4294901760, %v412_v56  ;;  %v1847_v47 = vsub.f32 %v592_v2, %v1822_v32  ;;  %v588_v53 = vld [vmem:[#allocation8 + $0x18] sm:$0xff] }
  0x2b   :  { %355 = vmatpush.msrb.mxu2 %v1585_v40  ;;  %189 = vmatpush.msra.mxu1 %v188_v38  ;;  %v419_v18 = vand.u32 4294901760, %v418_v16 }
  0x2c   :  { %289 = vmatpush.msrb.mxu0 %v162_v25  ;;  %402 = vmatpush.msrb.mxu3 %v401_v45  ;;  %v429_v25 = vand.u32 4294901760, %v1684_v23 }
  0x2d   :  { %357 = vmatpush.msrb.mxu2 %v1599_v49  ;;  %195 = vmatpush.msra.mxu1 %v194_v43 }
  0x2e   :  { %235 = vmatmul.f32.vlgmr.msra.gmra.mxu2 %v1644_v13  ;;  %293 = vmatpush.msrb.mxu0 %v168_v26  ;;  %v598_v26 = vld [vmem:[#allocation8 + $0x68] sm:$0xff] }
  0x2f   :  { %324 = vmatpush.msrb.mxu1 %v1515_v3  ;;  %359 = vmatpush.msrb.mxu2 %v1607_v52  ;;  %v424_v3 = vsub.f32 %v1677_v55, %v423_v60 }
  0x30   :  { %408 = vmatpush.msrb.mxu3 %v407_v15  ;;  %136 = vmatmul.f32.vlgmr.msra.gmra.mxu0 %v135_v24 }
  0x31   :  { %326 = vmatpush.msrb.mxu1 %v1517_v4  ;;  %361 = vmatpush.msrb.mxu2 %v1610_v54  ;;  %v430_v4 = vsub.f32 %v1684_v23, %v429_v25 }
  0x32   :  { %266 = vmatmul.f32.vlgmr.msra.gmra.mxu3 %v1659_v37  ;;  %297 = vmatpush.msrb.mxu0 %v174_v27  ;;  %v597_v27 = vld [vmem:[#allocation8 + $0x60] sm:$0xff] }
  0x33   :  { %328 = vmatpush.msrb.mxu1 %v1519_v5  ;;  %363 = vmatpush.msrb.mxu2 %v1636_v7  ;;  %v425_v5 = vand.u32 4294901760, %v424_v3  ;;  %v431_v19 = vand.u32 4294901760, %v430_v4 }
  0x34   :  { %414 = vmatpush.msrb.mxu3 %v413_v61  ;;  %197 = vmatmul.f32.vlgmr.msra.gmra.mxu1 %v1623_v62  ;;  %v1871_v61 = vand.u32 4294901760, %v588_v53 }
  0x35   :  { %330 = vmatpush.msrb.mxu1 %v1521_v9  ;;  %301 = vmatpush.msrb.mxu0 %v180_v29  ;;  %v600_v9 = vld [vmem:[#allocation8 + $0x78] sm:$0xff] }
  0x36   :  { %365 = vmatpush.msrb.mxu2 %v1654_v36  ;;  %420 = vmatpush.msrb.mxu3 %v419_v18  ;;  %v1731_v20 = vand.u32 4294901760, %v600_v9  ;;  %v596_v29 = vld [vmem:[#allocation8 + $0x58] sm:$0xff]  ;;  %v586_v18 = vld [vmem:[#allocation8 + $0x8] sm:$0xff] }
  0x37   :  { %332 = vmatpush.msrb.mxu1 %v1523_v10  ;;  %305 = vmatpush.msrb.mxu0 %v186_v46  ;;  %v599_v10 = vld [vmem:[#allocation8 + $0x70] sm:$0xff] }
  0x38   :  { %367 = vmatpush.msrb.mxu2 %v1665_v42  ;;  %426 = vmatpush.msrb.mxu3 %v425_v5  ;;  %v595_v46 = vld [vmem:[#allocation8 + $0x50] sm:$0xff] }
  0x39   :  { %334 = vmatpush.msrb.mxu1 %v1525_v11  ;;  %309 = vmatpush.msrb.mxu0 %v192_v51  ;;  %v1738_v11 = vand.u32 4294901760, %v599_v10 }
  0x3a   :  { %518 = vmatpush.msra.mxu2 %v387_v57  ;;  %432 = vmatpush.msrb.mxu3 %v431_v19  ;;  %v1781_v57 = vand.u32 4294901760, %v595_v46 }
  0x3b   :  { %336 = vmatpush.msrb.mxu1 %v1538_v17  ;;  %311 = vmatmul.f32.vlgmr.msrb.gmra.mxu0 %v1623_v62  ;;  %v1746_v17 = vsub.f32 %v600_v9, %v1731_v20  ;;  %v1756_v28 = vsub.f32 %v599_v10, %v1738_v11 }
  0x3c   :  { %448 = vmatpush.msra.mxu0 %v1597_v48  ;;  %522 = vmatpush.msra.mxu2 %v393_v58  ;;  %v1770_v48 = vand.u32 4294901760, %v596_v29 }
  0x3d   :  { %561 = vmatpush.msra.mxu3 %v1574_v34  ;;  %338 = vmatpush.msrb.mxu1 %v1549_v21  ;;  %v1750_v21 = vand.u32 4294901760, %v598_v26  ;;  %v664_v35 = vand.u32 4294901760, %v1746_v17 }
  0x3e   :  { %340 = vmatmul.f32.vlgmr.msrb.gmra.mxu1 %v1623_v62  ;;  %451 = vmatpush.msra.mxu0 %v1602_v50  ;;  %v670_v50 = vand.u32 4294901760, %v1756_v28 }
  0x3f   :  { %485 = vmatpush.msra.mxu1 %v1574_v34  ;;  %526 = vmatpush.msra.mxu2 %v399_v6  ;;  %v1759_v34 = vand.u32 4294901760, %v597_v27  ;;  %v665_v58 = vsub.f32 %v1746_v17, %v664_v35  ;;  %v1807_v6 = vsub.f32 %v595_v46, %v1781_v57  ;;  %v1893_v46 = vsub.f32 %v588_v53, %v1871_v61  ;;  %v614_v53 = vld [vmem:[#allocation8 + $0xe8] sm:$0xff] }
  0x40   :  { %563 = vmatpush.msra.mxu3 %v1585_v40  ;;  %454 = vmatpush.msra.mxu0 %v1616_v59  ;;  %v593_v59 = vld [vmem:[#allocation8 + $0x40] sm:$0xff]  ;;  %v671_v1 = vsub.f32 %v1756_v28, %v670_v50 }
  0x41   :  { %487 = vmatpush.msra.mxu1 %v1585_v40  ;;  %530 = vmatpush.msra.mxu2 %v405_v33  ;;  %v1768_v40 = vsub.f32 %v598_v26, %v1750_v21  ;;  %v1779_v51 = vsub.f32 %v597_v27, %v1759_v34  ;;  %v1809_v8 = vand.u32 4294901760, %v593_v59  ;;  %v666_v12 = vand.u32 4294901760, %v665_v58  ;;  %v590_v33 = vld [vmem:[#allocation8 + $0x28] sm:$0xff]  ;;  %v585_v26 = vld [vmem:[#allocation8] sm:$0xff] }
  0x42   :  { %565 = vmatpush.msra.mxu3 %v1599_v49  ;;  %373 = vmatmul.f32.vlgmr.msrb.gmra.mxu2 %v135_v24  ;;  %v672_v38 = vand.u32 4294901760, %v671_v1  ;;  %v694_v39 = vand.u32 4294901760, %v1807_v6  ;;  %v587_v24 = vld [vmem:[#allocation8 + $0x10] sm:$0xff] }
  0x43   :  { %457 = vmatpush.msra.mxu0 %v1626_v63  ;;  %489 = vmatpush.msra.mxu1 %v1599_v49  ;;  %v594_v49 = vld [vmem:[#allocation8 + $0x48] sm:$0xff]  ;;  %v1793_v63 = vsub.f32 %v596_v29, %v1770_v48  ;;  %v1883_v9 = vand.u32 4294901760, %v587_v24 }
  0x44   :  { %534 = vmatpush.msra.mxu2 %v411_v44  ;;  %567 = vmatpush.msra.mxu3 %v1607_v52  ;;  %v1795_v0 = vand.u32 4294901760, %v594_v49  ;;  %v589_v44 = vld [vmem:[#allocation8 + $0x20] sm:$0xff] }
  0x45   :  { %434 = vmatmul.f32.vlgmr.msrb.gmra.mxu3 %v1623_v62  ;;  %460 = vmatpush.msra.mxu0 %v1647_v22  ;;  %v591_v22 = vld [vmem:[#allocation8 + $0x30] sm:$0xff]  ;;  %v688_v30 = vand.u32 4294901760, %v1793_v63 }
  0x46   :  { %491 = vmatpush.msra.mxu1 %v1607_v52  ;;  %538 = vmatpush.msra.mxu2 %v417_v14  ;;  %v676_v52 = vand.u32 4294901760, %v1768_v40  ;;  %v1820_v31 = vsub.f32 %v594_v49, %v1795_v0  ;;  %v1835_v43 = vand.u32 4294901760, %v591_v22  ;;  %v695_v14 = vsub.f32 %v1807_v6, %v694_v39 }
  0x47   :  { %569 = vmatpush.msra.mxu3 %v1610_v54  ;;  %463 = vmatpush.msra.mxu0 %v1663_v41  ;;  %v1833_v41 = vsub.f32 %v593_v59, %v1809_v8  ;;  %v1895_v49 = vand.u32 4294901760, %v586_v18  ;;  %v616_v59 = vld [vmem:[#allocation8 + $0xf8] sm:$0xff] }
  0x48   :  { %493 = vmatpush.msra.mxu1 %v1610_v54  ;;  %542 = vmatpush.msra.mxu2 %v423_v60  ;;  %v682_v54 = vand.u32 4294901760, %v1779_v51  ;;  %v700_v45 = vand.u32 4294901760, %v1820_v31  ;;  %v1859_v56 = vsub.f32 %v591_v22, %v1835_v43  ;;  %v696_v4 = vand.u32 4294901760, %v695_v14 }
  0x49   :  { %571 = vmatpush.msra.mxu3 %v1636_v7  ;;  %466 = vmatpush.msra.mxu0 %v1677_v55  ;;  %v1907_v22 = vand.u32 4294901760, %v585_v26 }
  0x4a   :  { %495 = vmatpush.msra.mxu1 %v1636_v7  ;;  %546 = vmatpush.msra.mxu2 %v429_v25  ;;  %v677_v7 = vsub.f32 %v1768_v40, %v676_v52  ;;  %v701_v16 = vsub.f32 %v1820_v31, %v700_v45  ;;  %v712_v25 = vand.u32 4294901760, %v1847_v47  ;;  %v718_v19 = vand.u32 4294901760, %v1859_v56 }
  0x4b   :  { %573 = vmatpush.msra.mxu3 %v1654_v36  ;;  %548 = vmatmul.f32.vlgmr.msra.gmra.mxu2 %v1623_v62 }
  0x4c   :  { %469 = vmatpush.msra.mxu0 %v1684_v23  ;;  %497 = vmatpush.msra.mxu1 %v1654_v36  ;;  %v683_v36 = vsub.f32 %v1779_v51, %v682_v54  ;;  %v706_v23 = vand.u32 4294901760, %v1833_v41  ;;  %v702_v27 = vand.u32 4294901760, %v701_v16  ;;  %v713_v29 = vsub.f32 %v1847_v47, %v712_v25 }
  0x4d   :  { %575 = vmatpush.msra.mxu3 %v1665_v42  ;;  %472 = vmatmul.f32.vlgmr.msra.gmra.mxu0 %v1644_v13  ;;  %v1839_v13 = vand.u32 4294901760, %v590_v33  ;;  %v719_v2 = vsub.f32 %v1859_v56, %v718_v19 }
  0x4e   :  { %577 = vmatmul.f32.vlgmr.msra.gmra.mxu3 %v1623_v62  ;;  %499 = vmatpush.msra.mxu1 %v1665_v42  ;;  %v678_v62 = vand.u32 4294901760, %v677_v7  ;;  %v689_v42 = vsub.f32 %v1793_v63, %v688_v30  ;;  %v684_v55 = vand.u32 4294901760, %v683_v36  ;;  %v707_v5 = vsub.f32 %v1833_v41, %v706_v23 }
  0x4f   :  { %503 = vmatmul.f32.vlgmr.msra.gmra.mxu1 %v1659_v37  ;;  %765 = vmatpush.msrb.mxu2 %v1746_v17  ;;  %v1851_v37 = vand.u32 4294901760, %v589_v44  ;;  %v1864_v15 = vsub.f32 %v590_v33, %v1839_v13  ;;  %v615_v33 = vld [vmem:[#allocation8 + $0xf0] sm:$0xff]  ;;  %v736_v36 = vand.u32 4294901760, %v1893_v46 }
  0x50   :  { %667 = vmatpush.msrb.mxu1 %v666_v12  ;;  %818 = vmatpush.msrb.mxu3 %v1731_v20  ;;  %v690_v60 = vand.u32 4294901760, %v689_v42  ;;  %v708_v1 = vand.u32 4294901760, %v707_v5  ;;  %v1905_v12 = vsub.f32 %v587_v24, %v1883_v9  ;;  %v1929_v24 = vsub.f32 %v585_v26, %v1907_v22  ;;  %v611_v17 = vld [vmem:[#allocation8 + $0xd0] sm:$0xff] }
  0x51   :  { %768 = vmatpush.msrb.mxu2 %v1756_v28  ;;  %622 = vmatpush.msrb.mxu0 %v1731_v20  ;;  %v1876_v3 = vsub.f32 %v589_v44, %v1851_v37  ;;  %v724_v10 = vand.u32 4294901760, %v1864_v15  ;;  %v1917_v44 = vsub.f32 %v586_v18, %v1895_v49  ;;  %v613_v18 = vld [vmem:[#allocation8 + $0xe0] sm:$0xff]  ;;  %v2055_v28 = vand.u32 4294901760, %v611_v17 }
  0x52   :  { %673 = vmatpush.msrb.mxu1 %v672_v38  ;;  %820 = vmatpush.msrb.mxu3 %v1738_v11  ;;  %v714_v38 = vand.u32 4294901760, %v713_v29  ;;  %v2268_v14 = vand.u32 4294901760, %v1905_v12 }
  0x53   :  { %771 = vmatpush.msrb.mxu2 %v1768_v40  ;;  %624 = vmatpush.msrb.mxu0 %v1738_v11  ;;  %v730_v58 = vand.u32 4294901760, %v1876_v3  ;;  %v725_v7 = vsub.f32 %v1864_v15, %v724_v10  ;;  %v2269_v5 = vand.u32 4294901760, %v1917_v44 }
  0x54   :  { %679 = vmatpush.msrb.mxu1 %v678_v62  ;;  %822 = vmatpush.msrb.mxu3 %v1750_v21  ;;  %v1919_v62 = vand.u32 4294901760, %v616_v59 }
  0x55   :  { %774 = vmatpush.msrb.mxu2 %v1779_v51  ;;  %626 = vmatpush.msrb.mxu0 %v1750_v21  ;;  %v731_v42 = vsub.f32 %v1876_v3, %v730_v58  ;;  %v726_v16 = vand.u32 4294901760, %v725_v7  ;;  %v2276_v51 = vand.u32 4294901760, %v1917_v44 }
  0x56   :  { %685 = vmatpush.msrb.mxu1 %v684_v55  ;;  %824 = vmatpush.msrb.mxu3 %v1759_v34  ;;  %v720_v55 = vand.u32 4294901760, %v719_v2  ;;  %v1941_v26 = vsub.f32 %v616_v59, %v1919_v62  ;;  %v754_v2 = vand.u32 4294901760, %v1929_v24  ;;  %v1955_v59 = vand.u32 4294901760, %v613_v18 }
  0x57   :  { %777 = vmatpush.msrb.mxu2 %v1793_v63  ;;  %628 = vmatpush.msrb.mxu0 %v1759_v34  ;;  %v732_v29 = vand.u32 4294901760, %v731_v42  ;;  %v749_v42 = vsub.f32 %v1917_v44, %v2269_v5 }
  0x58   :  { %691 = vmatpush.msrb.mxu1 %v690_v60  ;;  %826 = vmatpush.msrb.mxu3 %v1770_v48  ;;  %v1931_v60 = vand.u32 4294901760, %v615_v33  ;;  %v1975_v5 = vsub.f32 %v613_v18, %v1955_v59 }
  0x59   :  { %780 = vmatpush.msrb.mxu2 %v1807_v6  ;;  %630 = vmatpush.msrb.mxu0 %v1770_v48  ;;  %v608_v6 = vld [vmem:[#allocation8 + $0xb8] sm:$0xff] }
  0x5a   :  { %697 = vmatpush.msrb.mxu1 %v696_v4  ;;  %828 = vmatpush.msrb.mxu3 %v1781_v57  ;;  %v737_v4 = vsub.f32 %v1893_v46, %v736_v36  ;;  %v1953_v7 = vsub.f32 %v615_v33, %v1931_v60 }
  0x5b   :  { %783 = vmatpush.msrb.mxu2 %v1820_v31  ;;  %632 = vmatpush.msrb.mxu0 %v1781_v57 }
  0x5c   :  { %703 = vmatpush.msrb.mxu1 %v702_v27  ;;  %830 = vmatpush.msrb.mxu3 %v1795_v0  ;;  %v1943_v27 = vand.u32 4294901760, %v614_v53 }
  0x5d   :  { %786 = vmatpush.msrb.mxu2 %v1833_v41  ;;  %634 = vmatpush.msrb.mxu0 %v1795_v0  ;;  %v607_v41 = vld [vmem:[#allocation8 + $0xb0] sm:$0xff] }
  0x5e   :  { %709 = vmatpush.msrb.mxu1 %v708_v1  ;;  %832 = vmatpush.msrb.mxu3 %v1809_v8  ;;  %v743_v1 = vsub.f32 %v1905_v12, %v2268_v14  ;;  %v1965_v14 = vsub.f32 %v614_v53, %v1943_v27  ;;  %v750_v53 = vand.u32 4294901760, %v749_v42  ;;  %v1023_v42 = vand.u32 4294901760, %v1975_v5 }
  0x5f   :  { %789 = vmatpush.msrb.mxu2 %v1847_v47  ;;  %636 = vmatpush.msrb.mxu0 %v1809_v8  ;;  %v2095_v47 = vand.u32 4294901760, %v607_v41 }
  0x60   :  { %715 = vmatpush.msrb.mxu1 %v714_v38  ;;  %834 = vmatpush.msrb.mxu3 %v1822_v32  ;;  %v738_v38 = vand.u32 4294901760, %v737_v4  ;;  %v744_v33 = vand.u32 4294901760, %v743_v1  ;;  %v2271_v4 = vand.u32 4294901760, %v1953_v7  ;;  %v1017_v1 = vand.u32 4294901760, %v1965_v14 }
  0x61   :  { %792 = vmatpush.msrb.mxu2 %v1859_v56  ;;  %638 = vmatpush.msrb.mxu0 %v1822_v32 }
  0x62   :  { %721 = vmatpush.msrb.mxu1 %v720_v55  ;;  %836 = vmatpush.msrb.mxu3 %v1835_v43  ;;  %v2270_v55 = vand.u32 4294901760, %v1941_v26 }
  0x63   :  { %795 = vmatpush.msrb.mxu2 %v1864_v15  ;;  %640 = vmatpush.msrb.mxu0 %v1835_v43 }
  0x64   :  { %727 = vmatpush.msrb.mxu1 %v726_v16  ;;  %838 = vmatpush.msrb.mxu3 %v1839_v13  ;;  %v755_v16 = vsub.f32 %v1929_v24, %v754_v2 }
  0x65   :  { %798 = vmatpush.msrb.mxu2 %v1876_v3  ;;  %642 = vmatpush.msrb.mxu0 %v1839_v13 }
  0x66   :  { %733 = vmatpush.msrb.mxu1 %v732_v29  ;;  %840 = vmatpush.msrb.mxu3 %v1851_v37  ;;  %v1006_v29 = vsub.f32 %v1941_v26, %v2270_v55  ;;  %v756_v18 = vand.u32 4294901760, %v755_v16 }
  0x67   :  { %801 = vmatpush.msrb.mxu2 %v1893_v46  ;;  %644 = vmatpush.msrb.mxu0 %v1851_v37 }
  0x68   :  { %739 = vmatpush.msrb.mxu1 %v738_v38  ;;  %842 = vmatpush.msrb.mxu3 %v1871_v61  ;;  %v1012_v38 = vsub.f32 %v1953_v7, %v2271_v4  ;;  %v1007_v55 = vand.u32 4294901760, %v1006_v29  ;;  %v1024_v4 = vsub.f32 %v1975_v5, %v1023_v42 }
  0x69   :  { %804 = vmatpush.msrb.mxu2 %v1905_v12  ;;  %646 = vmatpush.msrb.mxu0 %v1871_v61 }
  0x6a   :  { %745 = vmatpush.msrb.mxu1 %v744_v33  ;;  %844 = vmatpush.msrb.mxu3 %v1883_v9  ;;  %v1018_v33 = vsub.f32 %v1965_v14, %v1017_v1  ;;  %v1013_v16 = vand.u32 4294901760, %v1012_v38  ;;  %v1025_v29 = vand.u32 4294901760, %v1024_v4 }
  0x6b   :  { %807 = vmatpush.msrb.mxu2 %v1917_v44  ;;  %648 = vmatpush.msrb.mxu0 %v1883_v9 }
  0x6c   :  { %751 = vmatpush.msrb.mxu1 %v750_v53  ;;  %846 = vmatpush.msrb.mxu3 %v1895_v49  ;;  %v1019_v53 = vand.u32 4294901760, %v1018_v33 }
  0x6d   :  { %810 = vmatpush.msrb.mxu2 %v1929_v24  ;;  %650 = vmatpush.msrb.mxu0 %v1895_v49 }
  0x6e   :  { %757 = vmatpush.msrb.mxu1 %v756_v18  ;;  %848 = vmatpush.msrb.mxu3 %v1907_v22 }
  0x6f   :  { %963 = vmatpush.msra.mxu2 %v1919_v62  ;;  %652 = vmatpush.msrb.mxu0 %v1907_v22 }
  0x70   :  { %926 = vmatpush.msra.mxu1 %v1731_v20  ;;  %1008 = vmatpush.msra.mxu3 %v1007_v55  ;;  %v612_v20 = vld [vmem:[#allocation8 + $0xd8] sm:$0xff]  ;;  %v603_v55 = vld [vmem:[#allocation8 + $0x90] sm:$0xff] }
  0x71   :  { %965 = vmatpush.msra.mxu2 %v1931_v60  ;;  %859 = vmatpush.msra.mxu0 %v664_v35  ;;  %v610_v35 = vld [vmem:[#allocation8 + $0xc8] sm:$0xff] }
  0x72   :  { %928 = vmatpush.msra.mxu1 %v1738_v11  ;;  %1014 = vmatpush.msra.mxu3 %v1013_v16  ;;  %v2046_v11 = vand.u32 4294901760, %v612_v20  ;;  %v2139_v16 = vand.u32 4294901760, %v603_v55 }
  0x73   :  { %967 = vmatpush.msra.mxu2 %v1943_v27  ;;  %863 = vmatpush.msra.mxu0 %v670_v50  ;;  %v2065_v50 = vand.u32 4294901760, %v610_v35 }
  0x74   :  { %930 = vmatpush.msra.mxu1 %v1750_v21  ;;  %1020 = vmatpush.msra.mxu3 %v1019_v53  ;;  %v2053_v21 = vsub.f32 %v612_v20, %v2046_v11  ;;  %v602_v53 = vld [vmem:[#allocation8 + $0x88] sm:$0xff] }
  0x75   :  { %969 = vmatpush.msra.mxu2 %v1955_v59  ;;  %867 = vmatpush.msra.mxu0 %v676_v52 }
  0x76   :  { %932 = vmatpush.msra.mxu1 %v1759_v34  ;;  %1026 = vmatpush.msra.mxu3 %v1025_v29  ;;  %v2275_v34 = vand.u32 4294901760, %v1905_v12  ;;  %v1029_v40 = vand.u32 4294901760, %v2053_v21  ;;  %v604_v12 = vld [vmem:[#allocation8 + $0x98] sm:$0xff] }
  0x77   :  { %871 = vmatpush.msra.mxu0 %v682_v54  ;;  %971 = vmatpush.msra.mxu2 %v2046_v11  ;;  %v2128_v24 = vand.u32 4294901760, %v604_v12 }
  0x78   :  { %934 = vmatpush.msra.mxu1 %v1770_v48  ;;  %v2063_v48 = vsub.f32 %v611_v17, %v2055_v28  ;;  %v1030_v52 = vsub.f32 %v2053_v21, %v1029_v40 }
  0x79   :  { %875 = vmatpush.msra.mxu0 %v688_v30  ;;  %973 = vmatpush.msra.mxu2 %v2055_v28  ;;  %v2136_v33 = vsub.f32 %v604_v12, %v2128_v24  ;;  %v97_v12 = vld [vmem:[#allocation7] sm:$0x3] }
  0x7a   :  { %936 = vmatpush.msra.mxu1 %v1781_v57  ;;  %v609_v57 = vld [vmem:[#allocation8 + $0xc0] sm:$0xff]  ;;  %v1035_v63 = vand.u32 4294901760, %v2063_v48 }
  0x7b   :  { %879 = vmatpush.msra.mxu0 %v694_v39  ;;  %975 = vmatpush.msra.mxu2 %v2065_v50  ;;  %v2077_v54 = vand.u32 4294901760, %v609_v57  ;;  %v2089_v39 = vand.u32 4294901760, %v608_v6  ;;  %v1077_v17 = vand.u32 4294901760, %v2136_v33 }
  0x7c   :  { %938 = vmatpush.msra.mxu1 %v1795_v0  ;;  %v2075_v0 = vsub.f32 %v610_v35, %v2065_v50  ;;  %v1036_v30 = vsub.f32 %v2063_v48, %v1035_v63  ;;  %v2149_v35 = vsub.f32 %v603_v55, %v2139_v16 }
  0x7d   :  { %883 = vmatpush.msra.mxu0 %v700_v45  ;;  %977 = vmatpush.msra.mxu2 %v2077_v54 }
  0x7e   :  { %940 = vmatpush.msra.mxu1 %v1809_v8  ;;  %v1031_v8 = vand.u32 4294901760, %v1030_v52  ;;  %v1041_v31 = vand.u32 4294901760, %v2075_v0  ;;  %v1078_v52 = vsub.f32 %v2136_v33, %v1077_v17 }
  0x7f   :  { %887 = vmatpush.msra.mxu0 %v706_v23  ;;  %979 = vmatpush.msra.mxu2 %v2089_v39  ;;  %v606_v23 = vld [vmem:[#allocation8 + $0xa8] sm:$0xff] }
  0x80   :  { %942 = vmatpush.msra.mxu1 %v1822_v32  ;;  %v2087_v32 = vsub.f32 %v609_v57, %v2077_v54  ;;  %1032 = vmatpush.msra.mxu3 %v1031_v8 }
  0x81   :  { %891 = vmatpush.msra.mxu0 %v712_v25  ;;  %v2105_v25 = vsub.f32 %v607_v41, %v2095_v47  ;;  %981 = vmatpush.msra.mxu2 %v2095_v47  ;;  %v1079_v41 = vand.u32 4294901760, %v1078_v52 }
  0x82   :  { %944 = vmatpush.msra.mxu1 %v1835_v43  ;;  %v1037_v43 = vand.u32 4294901760, %v1036_v30  ;;  %v1047_v45 = vand.u32 4294901760, %v2087_v32  ;;  %v2274_v30 = vand.u32 4294901760, %v2149_v35 }
  0x83   :  { %895 = vmatpush.msra.mxu0 %v718_v19  ;;  %v605_v19 = vld [vmem:[#allocation8 + $0xa0] sm:$0xff] }
  0x84   :  { %946 = vmatpush.msra.mxu1 %v1839_v13  ;;  %v1042_v13 = vsub.f32 %v2075_v0, %v1041_v31  ;;  %1038 = vmatpush.msra.mxu3 %v1037_v43  ;;  %v1048_v15 = vsub.f32 %v2087_v32, %v1047_v45 }
  0x85   :  { %899 = vmatpush.msra.mxu0 %v724_v10  ;;  %v1059_v10 = vand.u32 4294901760, %v2105_v25 }
  0x86   :  { %948 = vmatpush.msra.mxu1 %v1851_v37  ;;  %v2099_v37 = vsub.f32 %v608_v6, %v2089_v39  ;;  %v1043_v56 = vand.u32 4294901760, %v1042_v13 }
  0x87   :  { %903 = vmatpush.msra.mxu0 %v730_v58 }
  0x88   :  { %950 = vmatpush.msra.mxu1 %v1871_v61  ;;  %v2107_v61 = vand.u32 4294901760, %v606_v23  ;;  %v1053_v3 = vand.u32 4294901760, %v2099_v37  ;;  %1044 = vmatpush.msra.mxu3 %v1043_v56 }
  0x89   :  { %907 = vmatpush.msra.mxu0 %v736_v36 }
  0x8a   :  { %952 = vmatpush.msra.mxu1 %v1883_v9  ;;  %v1049_v9 = vand.u32 4294901760, %v1048_v15  ;;  %v2113_v46 = vsub.f32 %v606_v23, %v2107_v61  ;;  %v1054_v58 = vsub.f32 %v2099_v37, %v1053_v3  ;;  %983 = vmatpush.msra.mxu2 %v2107_v61  ;;  %v1084_v23 = vsub.f32 %v2149_v35, %v2274_v30 }
  0x8b   :  { %911 = vmatpush.msra.mxu0 %v2275_v34  ;;  %v2145_v34 = vand.u32 4294901760, %v602_v53  ;;  %v100_v30 = vperm.slane %v97_v12, 1 }
  0x8c   :  { %954 = vmatpush.msra.mxu1 %v1895_v49  ;;  %v2115_v49 = vand.u32 4294901760, %v605_v19  ;;  %1050 = vmatpush.msra.mxu3 %v1049_v9  ;;  %v1065_v36 = vand.u32 4294901760, %v2113_v46 }
  0x8d   :  { %915 = vmatpush.msra.mxu0 %v2276_v51  ;;  %v601_v51 = vld [vmem:[#allocation8 + $0x80] sm:$0xff]  ;;  %v2155_v6 = vsub.f32 %v602_v53, %v2145_v34 }
  0x8e   :  { %956 = vmatpush.msra.mxu1 %v1907_v22  ;;  %v1060_v22 = vsub.f32 %v2105_v25, %v1059_v10  ;;  %v2126_v44 = vsub.f32 %v605_v19, %v2115_v49  ;;  %985 = vmatpush.msra.mxu2 %v2115_v49  ;;  %v1066_v18 = vsub.f32 %v2113_v46, %v1065_v36  ;;  %v2157_v8 = vand.u32 4294901760, %v601_v51 }
  0x8f   :  { %919 = vmatpush.msra.mxu0 %v754_v2  ;;  %v1055_v2 = vand.u32 4294901760, %v1054_v58  ;;  %v2272_v43 = vand.u32 4294901760, %v2155_v6  ;;  %v1085_v19 = vand.u32 4294901760, %v1084_v23 }
  0x90   :  { %v1061_v4 = vand.u32 4294901760, %v1060_v22  ;;  %v1071_v38 = vand.u32 4294901760, %v2126_v44  ;;  %987 = vmatpush.msra.mxu2 %v2128_v24  ;;  %v1067_v29 = vand.u32 4294901760, %v1066_v18  ;;  %v2163_v13 = vsub.f32 %v601_v51, %v2157_v8 }
  0x91   :  { %1056 = vmatpush.msra.mxu3 %v1055_v2  ;;  %v1090_v56 = vsub.f32 %v2155_v6, %v2272_v43  ;;  %v99_v2 = vperm.slane %v97_v12, 0 }
  0x92   :  { %v1072_v20 = vsub.f32 %v2126_v44, %v1071_v38  ;;  %989 = vmatpush.msra.mxu2 %v2139_v16  ;;  %v2273_v15 = vand.u32 4294901760, %v2163_v13 }
  0x93   :  { %1062 = vmatpush.msra.mxu3 %v1061_v4  ;;  %v1091_v9 = vand.u32 4294901760, %v1090_v56 }
  0x94   :  { %v1073_v57 = vand.u32 4294901760, %v1072_v20  ;;  %991 = vmatpush.msra.mxu2 %v2145_v34  ;;  %v1096_v58 = vsub.f32 %v2163_v13, %v2273_v15 }
  0x95   :  { %1068 = vmatpush.msra.mxu3 %v1067_v29 }
  0x96   :  { %993 = vmatpush.msra.mxu2 %v2157_v8  ;;  %v1097_v22 = vand.u32 4294901760, %v1096_v58 }
  0x97   :  { %1074 = vmatpush.msra.mxu3 %v1073_v57 }
  0x99   :  { %1080 = vmatpush.msra.mxu3 %v1079_v41 }
  0x9b   :  { %1086 = vmatpush.msra.mxu3 %v1085_v19 }
  0x9d   :  { %1092 = vmatpush.msra.mxu3 %v1091_v9 }
  0x9f   :  { %1098 = vmatpush.msra.mxu3 %v1097_v22 }
  0xad   :  { %v137_v55 = vpop.f32.mrf.mxu0 }
  0xae   :  { %v138_v4 = vadd.f32 %v137_v55, %v99_v2  ;;  %v2277_v55 = vand.u32 4294901760, %v1941_v26 }
  0xb1   :  { %v198_v18 = vpop.f32.mrf.mxu1  ;;  %v236_v53 = vpop.f32.mrf.mxu2 }
  0xb2   :  { %v199_v29 = vadd.f32 %v198_v18, %v138_v4 }
  0xb4   :  { %v237_v20 = vadd.f32 %v236_v53, %v199_v29 }
  0xb5   :  { %v267_v51 = vpop.f32.mrf.mxu3 }
  0xb6   :  { %v268_v57 = vadd.f32 %v267_v51, %v237_v20 }
  0xb8   :  { %v312_v52 = vpop.f32.mrf.mxu0 }
  0xb9   :  { %v313_v41 = vadd.f32 %v312_v52, %v268_v57 }
  0xbb   :  { %v341_v23 = vpop.f32.mrf.mxu1 }
  0xbc   :  { %v342_v56 = vadd.f32 %v341_v23, %v313_v41 }
  0xbe   :  { %v581_v43 = vmul.f32 0.01, %v342_v56 }
  0xc0   :  { %v583_v15 = vmax.f32 %v342_v56, %v581_v43 }
  0xc2   :  { %v653_v19 = vand.u32 4294901760, %v583_v15 }
  0xc4   :  { %v654_v58 = vsub.f32 %v583_v15, %v653_v19  ;;  %759 = vmatmul.f32.vlgmr.msrb.gmra.mxu1 %v653_v19  ;;  %v2278_v15 = vand.u32 4294901760, %v1953_v7 }
  0xc5   :  { %v374_v9 = vpop.f32.mrf.mxu2  ;;  %1159 = vmatpush.msrb.mxu1 %v1919_v62 }
  0xc6   :  { %v375_v22 = vadd.f32 %v374_v9, %v100_v30  ;;  %813 = vmatmul.f32.vlgmr.msrb.gmra.mxu2 %v654_v58  ;;  %v655_v2 = vand.u32 4294901760, %v654_v58 }
  0xc7   :  { %1161 = vmatpush.msrb.mxu1 %v1931_v60  ;;  %1200 = vmatpush.msrb.mxu2 %v2277_v55 }
  0xc8   :  { %v435_v4 = vpop.f32.mrf.mxu3  ;;  %852 = vmatmul.f32.vlgmr.msrb.gmra.mxu3 %v655_v2  ;;  %v656_v18 = vsub.f32 %v654_v58, %v655_v2 }
  0xc9   :  { %v436_v53 = vadd.f32 %v435_v4, %v375_v22  ;;  %1163 = vmatpush.msrb.mxu1 %v1943_v27  ;;  %1267 = vmatpush.msrb.mxu3 %v1919_v62 }
  0xca   :  { %v473_v43 = vpop.f32.mrf.mxu0  ;;  %1204 = vmatpush.msrb.mxu2 %v2278_v15  ;;  %v657_v30 = vand.u32 4294901760, %v656_v18 }
  0xcb   :  { %v474_v12 = vadd.f32 %v473_v43, %v436_v53  ;;  %1165 = vmatpush.msrb.mxu1 %v1955_v59  ;;  %1269 = vmatpush.msrb.mxu3 %v1931_v60 }
  0xcc   :  { %v504_v29 = vpop.f32.mrf.mxu1  ;;  %658 = vmatmul.f32.vlgmr.msrb.gmra.mxu0 %v657_v30  ;;  %958 = vmatmul.f32.vlgmr.msra.gmra.mxu1 %v653_v19 }
  0xcd   :  { %v505_v20 = vadd.f32 %v504_v29, %v474_v12  ;;  %1106 = vmatpush.msrb.mxu0 %v1941_v26  ;;  %1167 = vmatpush.msrb.mxu1 %v2046_v11 }
  0xce   :  { %v549_v51 = vpop.f32.mrf.mxu2  ;;  %1208 = vmatpush.msrb.mxu2 %v1017_v1  ;;  %1271 = vmatpush.msrb.mxu3 %v1943_v27 }
  0xcf   :  { %v550_v62 = vadd.f32 %v549_v51, %v505_v20  ;;  %1109 = vmatpush.msrb.mxu0 %v1953_v7  ;;  %1169 = vmatpush.msrb.mxu1 %v2055_v28 }
  0xd0   :  { %1212 = vmatpush.msrb.mxu2 %v1023_v42  ;;  %1273 = vmatpush.msrb.mxu3 %v1955_v59 }
  0xd1   :  { %v578_v60 = vpop.f32.mrf.mxu3  ;;  %1112 = vmatpush.msrb.mxu0 %v1965_v14  ;;  %1171 = vmatpush.msrb.mxu1 %v2065_v50 }
  0xd2   :  { %v579_v26 = vadd.f32 %v578_v60, %v550_v62  ;;  %1216 = vmatpush.msrb.mxu2 %v1029_v40  ;;  %1275 = vmatpush.msrb.mxu3 %v2046_v11  ;;  %v2279_v11 = vand.u32 4294901760, %v2149_v35  ;;  %v1335_v40 = vld [vmem:[%s2266_s4] ss:$0 sm:$0xff]  ;;  %s1472_s4 = smov [#allocation10]  }
  0xd3   :  { %1115 = vmatpush.msrb.mxu0 %v1975_v5  ;;  %1173 = vmatpush.msrb.mxu1 %v2077_v54  ;;  %s1312_s15 = sshll.u32 %s1472_s4, 4  ;;  %s1313_s15 = int_to_ptr.vmem [resolvable:$true] %s1312_s15 }
  0xd4   :  { %v582_v27 = vmul.f32 0.01, %v579_v26  ;;  %1220 = vmatpush.msrb.mxu2 %v1035_v63  ;;  %1277 = vmatpush.msrb.mxu3 %v2055_v28  ;;  %v2281_v28 = vand.u32 4294901760, %v2163_v13 }
  0xd5   :  { %921 = vmatmul.f32.vlgmr.msra.gmra.mxu0 %v653_v19  ;;  %1175 = vmatpush.msrb.mxu1 %v2089_v39 }
  0xd6   :  { %v584_v14 = vmax.f32 %v579_v26, %v582_v27  ;;  %1118 = vmatpush.msrb.mxu0 %v2053_v21  ;;  %1224 = vmatpush.msrb.mxu2 %v1041_v31  ;;  %v2280_v21 = vand.u32 4294901760, %v2155_v6 }
  0xd7   :  { %1279 = vmatpush.msrb.mxu3 %v2065_v50  ;;  %1177 = vmatpush.msrb.mxu1 %v2095_v47 }
  0xd8   :  { %v994_v5 = vand.u32 4294901760, %v584_v14  ;;  %1121 = vmatpush.msrb.mxu0 %v2063_v48  ;;  %1228 = vmatpush.msrb.mxu2 %v1047_v45 }
  0xd9   :  { %1281 = vmatpush.msrb.mxu3 %v2077_v54  ;;  %1179 = vmatpush.msrb.mxu1 %v2107_v61 }
  0xda   :  { %v995_v7 = vsub.f32 %v584_v14, %v994_v5  ;;  %1100 = vmatmul.f32.vlgmr.msra.gmra.mxu3 %v994_v5  ;;  %1124 = vmatpush.msrb.mxu0 %v2075_v0 }
  0xdb   :  { %1232 = vmatpush.msrb.mxu2 %v1053_v3  ;;  %1283 = vmatpush.msrb.mxu3 %v2089_v39 }
  0xdc   :  { %v996_v59 = vand.u32 4294901760, %v995_v7  ;;  %1127 = vmatpush.msrb.mxu0 %v2087_v32  ;;  %1181 = vmatpush.msrb.mxu1 %v2115_v49 }
  0xdd   :  { %1236 = vmatpush.msrb.mxu2 %v1059_v10  ;;  %1285 = vmatpush.msrb.mxu3 %v2095_v47 }
  0xde   :  { %1130 = vmatpush.msrb.mxu0 %v2099_v37  ;;  %1183 = vmatpush.msrb.mxu1 %v2128_v24  ;;  %v997_v1 = vsub.f32 %v995_v7, %v996_v59 }
  0xdf   :  { %1240 = vmatpush.msrb.mxu2 %v1065_v36  ;;  %1287 = vmatpush.msrb.mxu3 %v2107_v61 }
  0xe0   :  { %1133 = vmatpush.msrb.mxu0 %v2105_v25  ;;  %1185 = vmatpush.msrb.mxu1 %v2139_v16  ;;  %v998_v42 = vand.u32 4294901760, %v997_v1 }
  0xe1   :  { %1244 = vmatpush.msrb.mxu2 %v1071_v38  ;;  %1289 = vmatpush.msrb.mxu3 %v2115_v49 }
  0xe2   :  { %999 = vmatmul.f32.vlgmr.msra.gmra.mxu2 %v998_v42  ;;  %1136 = vmatpush.msrb.mxu0 %v2113_v46 }
  0xe3   :  { %1187 = vmatpush.msrb.mxu1 %v2145_v34  ;;  %1248 = vmatpush.msrb.mxu2 %v1077_v17 }
  0xe4   :  { %1291 = vmatpush.msrb.mxu3 %v2128_v24  ;;  %1139 = vmatpush.msrb.mxu0 %v2126_v44 }
  0xe5   :  { %1189 = vmatpush.msrb.mxu1 %v2157_v8  ;;  %1252 = vmatpush.msrb.mxu2 %v2279_v11 }
  0xe6   :  { %1293 = vmatpush.msrb.mxu3 %v2139_v16  ;;  %1193 = vmatmul.f32.vlgmr.msrb.gmra.mxu1 %v996_v59 }
  0xe7   :  { %1142 = vmatpush.msrb.mxu0 %v2136_v33  ;;  %1256 = vmatpush.msrb.mxu2 %v2280_v21 }
  0xe8   :  { %1295 = vmatpush.msrb.mxu3 %v2145_v34 }
  0xe9   :  { %1145 = vmatpush.msrb.mxu0 %v2149_v35  ;;  %1260 = vmatpush.msrb.mxu2 %v2281_v28 }
  0xea   :  { %1297 = vmatpush.msrb.mxu3 %v2157_v8  ;;  %1262 = vmatmul.f32.vlgmr.msrb.gmra.mxu2 %v994_v5 }
  0xeb   :  { %1299 = vmatmul.f32.vlgmr.msrb.gmra.mxu3 %v994_v5  ;;  %1148 = vmatpush.msrb.mxu0 %v2155_v6 }
  0xed   :  { %1151 = vmatpush.msrb.mxu0 %v2163_v13 }
  0xee   :  { %1154 = vmatmul.f32.vlgmr.msrb.gmra.mxu0 %v995_v7 }
 0x141   :  { %v760_v63 = vpop.f32.mrf.mxu1 }
 0x149   :  { %v659_v48 = vpop.f32.mrf.mxu0  ;;  %v814_v54 = vpop.f32.mrf.mxu2 }
 0x14a   :  { %v660_v50 = vadd.f32 %v1335_v40, %v659_v48  ;;  %v959_v37 = vpop.f32.mrf.mxu1 }
 0x14b   :  { %v853_v32 = vpop.f32.mrf.mxu3 }
 0x14c   :  { %v761_v0 = vadd.f32 %v760_v63, %v660_v50 }
 0x14e   :  { %v815_v31 = vadd.f32 %v814_v54, %v761_v0 }
 0x150   :  { %v854_v39 = vadd.f32 %v853_v32, %v815_v31 }
 0x152   :  { %v922_v45 = vpop.f32.mrf.mxu0 }
 0x153   :  { %v923_v47 = vadd.f32 %v922_v45, %v854_v39 }
 0x155   :  { %v960_v25 = vadd.f32 %v959_v37, %v923_v47 }
 0x15d   :  { %v1101_v10 = vpop.f32.mrf.mxu3 }
 0x163   :  { %v1194_v44 = vpop.f32.mrf.mxu1 }
 0x165   :  { %v1000_v61 = vpop.f32.mrf.mxu2 }
 0x166   :  { %v1001_v3 = vadd.f32 %v1000_v61, %v960_v25 }
 0x168   :  { %v1102_v46 = vadd.f32 %v1101_v10, %v1001_v3 }
 0x16b   :  { %v1155_v49 = vpop.f32.mrf.mxu0 }
 0x16c   :  { %v1156_v36 = vadd.f32 %v1155_v49, %v1102_v46 }
 0x16d   :  { %v1263_v38 = vpop.f32.mrf.mxu2 }
 0x16e   :  { %v1195_v24 = vadd.f32 %v1194_v44, %v1156_v36  ;;  %v1300_v16 = vpop.f32.mrf.mxu3 }
 0x170   :  { %v1264_v33 = vadd.f32 %v1263_v38, %v1195_v24 }
 0x172   :  { %v1301_v17 = vadd.f32 %v1300_v16, %v1264_v33 }
 0x174   :  { %v1303_v34 = vmul.f32 0.01, %v1301_v17 }
 0x176   :  { %v1304_v35 = vmax.f32 %v1301_v17, %v1303_v34 }
 0x178   :  { %1306 = vst.msk [vmem:[#allocation10] sm:$0xff] %vm1305_vm1, %v1304_v35 }
 0x179   :  { %1317 = dma.vmem_to_hbm [thread:$0]  %s1313_s15, 128, %s1315_s18, [#allocation4]  }
 0x17a   :  { %1462 = dma.done.wait [#allocation4], 128  }
 0x17b   :  { %1463 = vsyncadd [#allocation4], 4294967168 }
 0x17c   :  { %1322 = vsyncpa [#allocation3], 1 }
 0x17d   :  { %1323 = vsyncpa [#allocation6], 1 }
 0x17e   :  { %1324 = vsyncpa [#allocation9], 1 }
 0x17f   :  { %1325 = vsyncpa [#allocation4], 1 }

</bundles_post_ra>
